<compile_context>
chip_gen: v7x
topology: tpu7x:2x2x1
jax: 0.10.0
libtpu: 0.0.40
codegen_flags: <defaults>
</compile_context>

<pallas_src>
import functools

import jax
import jax.numpy as jnp
from jax import lax
from jax.experimental import pallas as pl
from jax.experimental.pallas import tpu as pltpu


# ------------------------------ fused kernel --------------------------------

def _bottleneck_kernel(x_ref, w1_ref, s1_ref, b1_ref,
                       w2_ref, s2_ref, b2_ref,
                       w3_ref, s3_ref, b3_ref,
                       o_ref, y1p_ref, patch_ref,
                       *, H, W, compute_dtype):
    """One batch element per grid step; all intermediates stay in VMEM.

    x_ref    : (1, Cin, H*W)   input block (NCHW, spatial flattened), f32
    w1_ref   : (Cin, DC)       conv1 1x1 weight (pre-transposed, compute dtype)
    w2_ref   : (9*DC, DC)      grouped 3x3 weight, block-diagonal per tap
    w3_ref   : (Cout, DC)      conv3 1x1 weight (compute dtype)
    s*/b*    : folded BatchNorm scale / shift (f32)
    o_ref    : (1, Cout, H*W)  output block (NCHW, spatial flattened), f32
    y1p_ref  : (H+2, W+2, DC)  VMEM scratch: stage-1 output with zero halo
    patch_ref: (H*W, 9*DC)     VMEM scratch: im2col patch for stage 2
    """
    HW = H * W
    DC = w1_ref.shape[1]
    cdt = compute_dtype

    x = x_ref[0]                                              # (Cin, HW) f32

    # ---- stage 1: 1x1 conv + BN1 + ReLU (contract over Cin) ---------------
    # dot_general folds the NCHW -> (HW, C) orientation change into the MXU.
    y1 = lax.dot_general(x.astype(cdt), w1_ref[...],
                         (((0,), (0,)), ((), ())),
                         preferred_element_type=jnp.float32)   # (HW, DC) f32
    y1 = jnp.maximum(y1 * s1_ref[...] + b1_ref[...], 0.0)

    # zero ONLY the four halo strips (interior is fully overwritten below).
    # Not gated on program_id: with "parallel" semantics each core's first
    # iteration must initialize its own scratch.
    zrow = jnp.zeros((1, W + 2, DC), jnp.float32)
    zcol = jnp.zeros((H, 1, DC), jnp.float32)
    y1p_ref[0:1, :, :] = zrow
    y1p_ref[H + 1:H + 2, :, :] = zrow
    y1p_ref[1:H + 1, 0:1, :] = zcol
    y1p_ref[1:H + 1, W + 1:W + 2, :] = zcol
    y1p_ref[1:H + 1, 1:W + 1, :] = y1.reshape(H, W, DC)

    # ---- stage 2: grouped 3x3 conv + BN2 + ReLU as ONE dense matmul -------
    # im2col: 9 shifted tap slices concatenated along K in VMEM, then a single
    # (HW, 9*DC) x (9*DC, DC) MXU pass against the block-diagonal grouped
    # weight (replaces 9*groups tiny per-group matmuls).
    for tap in range(9):                                       # static 3x3 taps
        dy, dx = tap // 3, tap % 3
        patch_ref[:, tap * DC:(tap + 1) * DC] = (
            y1p_ref[dy:dy + H, dx:dx + W, :].reshape(HW, DC))
    y2 = jnp.dot(patch_ref[...].astype(cdt), w2_ref[...],
                 preferred_element_type=jnp.float32)           # (HW, DC) f32
    y2 = jnp.maximum(y2 * s2_ref[...] + b2_ref[...], 0.0)

    # ---- stage 3: 1x1 conv + BN3 + residual + ReLU -------------------------
    # Contract over DC; result lands back in (Cout, HW) = NCHW orientation,
    # so the residual adds directly and no output transpose is needed.
    y3 = lax.dot_general(w3_ref[...], y2.astype(cdt),
                         (((1,), (1,)), ((), ())),
                         preferred_element_type=jnp.float32)   # (Cout, HW)
    y3 = y3 * s3_ref[...] + b3_ref[...] + x                    # residual = x
    o_ref[0] = jnp.maximum(y3, 0.0)


# ------------------------------ module wrapper ------------------------------

def _fold_bn(gamma, beta, mean, var, eps=1e-5):
    scale = gamma / jnp.sqrt(var + eps)
    shift = beta - mean * scale
    return scale, shift


def bottleneck_forward(x_nchw, params, cardinality, compute_dtype=jnp.float32):
    """ResNeXt Bottleneck forward (stride=1, no downsample, no channel pool)."""
    N, Cin, H, W = x_nchw.shape
    HW = H * W
    w1, w2, w3 = params["w1"], params["w2"], params["w3"]     # PyTorch OIHW
    DC = w1.shape[0]
    Cout = w3.shape[0]
    G = cardinality
    assert DC % G == 0, "conv2 channels must be divisible by cardinality"
    cpg = DC // G
    # Identity shortcut: this kernel implements the stride=1 / no-downsample
    # configuration, so the residual add requires matching channel counts.
    assert Cout == Cin, (
        f"identity shortcut requires Cout == Cin, got Cout={Cout}, Cin={Cin}")

    # fold BN (inference / running stats) into per-channel scale & shift (f32)
    s1, b1 = _fold_bn(*params["bn1"])
    s2, b2 = _fold_bn(*params["bn2"])
    s3, b3 = _fold_bn(*params["bn3"])
    s1, b1 = s1.reshape(1, DC), b1.reshape(1, DC)             # lane-oriented
    s2, b2 = s2.reshape(1, DC), b2.reshape(1, DC)
    s3, b3 = s3.reshape(Cout, 1), b3.reshape(Cout, 1)         # sublane-oriented

    # weight prep (tiny, done once under jit); pre-cast to compute dtype so the
    # kernel never casts weights per grid step.
    w1_t = jnp.transpose(w1[:, :, 0, 0]).astype(compute_dtype)   # (Cin, DC)
    w3_m = w3[:, :, 0, 0].astype(compute_dtype)                  # (Cout, DC)
    # grouped conv2 weights (DC, cpg, 3, 3) -> block-diagonal (9*DC, DC):
    # row tap*DC + (g*cpg + ci), col g*cpg + co  holds  w2[g*cpg+co, ci, dy, dx]
    w2_taps = jnp.transpose(w2.reshape(G, cpg, cpg, 3, 3),
                            (3, 4, 0, 2, 1)).reshape(9, G, cpg, cpg)
    w2_bd = jnp.zeros((9, DC, DC), jnp.float32)
    for g in range(G):
        sl = slice(g * cpg, (g + 1) * cpg)
        w2_bd = w2_bd.at[:, sl, sl].set(w2_taps[:, g])
    w2_bd = w2_bd.reshape(9 * DC, DC).astype(compute_dtype)

    # contiguous (free) reshape only — no NCHW<->NHWC transpose in the wrapper
    x_flat = x_nchw.reshape(N, Cin, HW)

    kernel = functools.partial(_bottleneck_kernel, H=H, W=W,
                               compute_dtype=compute_dtype)

    out = pl.pallas_call(
        kernel,
        out_shape=jax.ShapeDtypeStruct((N, Cout, HW), jnp.float32),
        grid=(N,),
        in_specs=[
            pl.BlockSpec((1, Cin, HW), lambda n: (n, 0, 0)),          # x
            pl.BlockSpec((Cin, DC), lambda n: (0, 0)),                # w1
            pl.BlockSpec((1, DC), lambda n: (0, 0)),                  # s1
            pl.BlockSpec((1, DC), lambda n: (0, 0)),                  # b1
            pl.BlockSpec((9 * DC, DC), lambda n: (0, 0)),             # w2 (bd)
            pl.BlockSpec((1, DC), lambda n: (0, 0)),                  # s2
            pl.BlockSpec((1, DC), lambda n: (0, 0)),                  # b2
            pl.BlockSpec((Cout, DC), lambda n: (0, 0)),               # w3
            pl.BlockSpec((Cout, 1), lambda n: (0, 0)),                # s3
            pl.BlockSpec((Cout, 1), lambda n: (0, 0)),                # b3
        ],
        out_specs=pl.BlockSpec((1, Cout, HW), lambda n: (n, 0, 0)),
        scratch_shapes=[pltpu.VMEM((H + 2, W + 2, DC), jnp.float32),   # halo
                        pltpu.VMEM((HW, 9 * DC), jnp.float32)],        # im2col
        compiler_params=pltpu.CompilerParams(
            dimension_semantics=("parallel",)),
    )(x_flat, w1_t, s1, b1, w2_bd, s2, b2, w3_m, s3, b3)

    return out.reshape(N, Cout, H, W)


# ------------------------------ pure-JAX reference --------------------------

def bottleneck_reference(x, params, cardinality):
    def bn(y, g, b, m, v, eps=1e-5):
        g, b, m, v = (a[None, :, None, None] for a in (g, b, m, v))
        return (y - m) / jnp.sqrt(v + eps) * g + b

    dn = ("NCHW", "OIHW", "NCHW")
    y = lax.conv_general_dilated(x, params["w1"], (1, 1), "VALID",
                                 dimension_numbers=dn)
    y = jax.nn.relu(bn(y, *params["bn1"]))
    y = lax.conv_general_dilated(y, params["w2"], (1, 1), ((1, 1), (1, 1)),
                                 dimension_numbers=dn,
                                 feature_group_count=cardinality)
    y = jax.nn.relu(bn(y, *params["bn2"]))
    y = lax.conv_general_dilated(y, params["w3"], (1, 1), "VALID",
                                 dimension_numbers=dn)
    y = bn(y, *params["bn3"])
    return jax.nn.relu(y + x)


# ----------------------------------- main ------------------------------------

if __name__ == "__main__":
    # Bottleneck(inplanes=16, planes=4, baseWidth=64, cardinality=2)
    #   D = floor(4 * 64/64) = 4, D*C = 8, out = planes*4 = 16 (== inplanes)
    inplanes, planes, baseWidth, cardinality = 16, 4, 64, 2
    D = (planes * baseWidth) // 64
    DC = D * cardinality
    Cout = planes * 4
    N, H, W = 2, 8, 8

    key = jax.random.PRNGKey(0)
    ks = jax.random.split(key, 8)

    def bn_params(k, C):
        k1, k2, k3, k4 = jax.random.split(k, 4)
        gamma = 0.5 + jax.random.uniform(k1, (C,), jnp.float32)
        beta = 0.1 * jax.random.normal(k2, (C,), jnp.float32)
        mean = 0.1 * jax.random.normal(k3, (C,), jnp.float32)
        var = 0.5 + jax.random.uniform(k4, (C,), jnp.float32)
        return gamma, beta, mean, var

    params = {
        "w1": 0.1 * jax.random.normal(ks[0], (DC, inplanes, 1, 1), jnp.float32),
        "w2": 0.1 * jax.random.normal(ks[1], (DC, DC // cardinality, 3, 3),
                                      jnp.float32),
        "w3": 0.1 * jax.random.normal(ks[2], (Cout, DC, 1, 1), jnp.float32),
        "bn1": bn_params(ks[3], DC),
        "bn2": bn_params(ks[4], DC),
        "bn3": bn_params(ks[5], Cout),
    }

    x = jax.random.normal(ks[6], (N, inplanes, H, W), jnp.float32)

    ref = bottleneck_reference(x, params, cardinality)

    # f32 MXU path (tight numerical check, v5e-style).
    fwd_f32 = jax.jit(functools.partial(bottleneck_forward,
                                        cardinality=cardinality,
                                        compute_dtype=jnp.float32))
    out_f32 = fwd_f32(x, params)
    jax.block_until_ready(out_f32)
    assert out_f32.shape == (N, Cout, H, W)
    assert jnp.allclose(out_f32, ref, atol=1e-4, rtol=1e-4), (
        float(jnp.max(jnp.abs(out_f32 - ref))))

    # bf16 MXU operands / weights + f32 accumulation & elementwise BN/ReLU
    # (v6e/v7x-style path; v5e VPU/EUP have no bf16 so elementwise stays f32).
    fwd_bf16 = jax.jit(functools.partial(bottleneck_forward,
                                         cardinality=cardinality,
                                         compute_dtype=jnp.bfloat16))
    out_bf16 = fwd_bf16(x, params)
    jax.block_until_ready(out_bf16)
    assert out_bf16.shape == (N, Cout, H, W)
    assert jnp.allclose(out_bf16, ref, atol=1e-1, rtol=1e-1), (
        float(jnp.max(jnp.abs(out_bf16 - ref))))

    print("KERNEL_OK")
</pallas_src>

<mosaic_0001>
module attributes {stable_mosaic.version = 11 : i64} {
  func.func @_bottleneck_kernel(%arg0: i32, %arg1: memref<1x16x64xf32, #tpu.memory_space<vmem>>, %arg2: memref<16x8xf32, #tpu.memory_space<vmem>>, %arg3: memref<1x8xf32, #tpu.memory_space<vmem>>, %arg4: memref<1x8xf32, #tpu.memory_space<vmem>>, %arg5: memref<72x8xf32, #tpu.memory_space<vmem>>, %arg6: memref<1x8xf32, #tpu.memory_space<vmem>>, %arg7: memref<1x8xf32, #tpu.memory_space<vmem>>, %arg8: memref<16x8xf32, #tpu.memory_space<vmem>>, %arg9: memref<16x1xf32, #tpu.memory_space<vmem>>, %arg10: memref<16x1xf32, #tpu.memory_space<vmem>>, %arg11: memref<1x16x64xf32, #tpu.memory_space<vmem>>, %arg12: memref<10x10x8xf32, #tpu.memory_space<vmem>>, %arg13: memref<64x72xf32, #tpu.memory_space<vmem>>) attributes {dimension_semantics = [#tpu.dimension_semantics<parallel>], iteration_bounds = array<i64: 2>, scalar_prefetch = 0 : i64, scratch_operands = 2 : i64, tpu.core_type = #tpu.core_type<tc>, window_params = [{transform_indices = @transform_0, window_bounds = array<i64: 1, 16, 64>}, {pipeline_mode = #tpu.pipeline_mode<synchronous>, transform_indices = @transform_1, window_bounds = array<i64: 16, 8>}, {pipeline_mode = #tpu.pipeline_mode<synchronous>, transform_indices = @transform_2, window_bounds = array<i64: 1, 8>}, {pipeline_mode = #tpu.pipeline_mode<synchronous>, transform_indices = @transform_3, window_bounds = array<i64: 1, 8>}, {pipeline_mode = #tpu.pipeline_mode<synchronous>, transform_indices = @transform_4, window_bounds = array<i64: 72, 8>}, {pipeline_mode = #tpu.pipeline_mode<synchronous>, transform_indices = @transform_5, window_bounds = array<i64: 1, 8>}, {pipeline_mode = #tpu.pipeline_mode<synchronous>, transform_indices = @transform_6, window_bounds = array<i64: 1, 8>}, {pipeline_mode = #tpu.pipeline_mode<synchronous>, transform_indices = @transform_7, window_bounds = array<i64: 16, 8>}, {pipeline_mode = #tpu.pipeline_mode<synchronous>, transform_indices = @transform_8, window_bounds = array<i64: 16, 1>}, {pipeline_mode = #tpu.pipeline_mode<synchronous>, transform_indices = @transform_9, window_bounds = array<i64: 16, 1>}, {transform_indices = @transform_10, window_bounds = array<i64: 1, 16, 64>}]} {
    %c0 = arith.constant 0 : index
    %c0_0 = arith.constant 0 : index
    %c0_1 = arith.constant 0 : index
    %0 = vector.load %arg1[%c0, %c0_0, %c0_1] : memref<1x16x64xf32, #tpu.memory_space<vmem>>, vector<1x16x64xf32>
    %1 = vector.shape_cast %0 : vector<1x16x64xf32> to vector<16x64xf32>
    %c0_2 = arith.constant 0 : index
    %c0_3 = arith.constant 0 : index
    %2 = vector.load %arg2[%c0_2, %c0_3] : memref<16x8xf32, #tpu.memory_space<vmem>>, vector<16x8xf32>
    %cst = arith.constant dense<0.000000e+00> : vector<64x8xf32>
    %3 = tpu.matmul %1, %2, %cst {dimension_numbers = #tpu.dot_dimension_numbers<[0], [0], [1], [1], [0, 1, 1, 1], [], []>} : vector<16x64xf32>, vector<16x8xf32>, vector<64x8xf32> -> vector<64x8xf32>
    %c0_4 = arith.constant 0 : index
    %c0_5 = arith.constant 0 : index
    %4 = vector.load %arg3[%c0_4, %c0_5] : memref<1x8xf32, #tpu.memory_space<vmem>>, vector<1x8xf32>
    %5 = vector.broadcast %4 : vector<1x8xf32> to vector<64x8xf32>
    %6 = arith.mulf %3, %5 : vector<64x8xf32>
    %c0_6 = arith.constant 0 : index
    %c0_7 = arith.constant 0 : index
    %7 = vector.load %arg4[%c0_6, %c0_7] : memref<1x8xf32, #tpu.memory_space<vmem>>, vector<1x8xf32>
    %8 = vector.broadcast %7 : vector<1x8xf32> to vector<64x8xf32>
    %9 = arith.addf %6, %8 : vector<64x8xf32>
    %cst_8 = arith.constant 0.000000e+00 : f32
    %10 = vector.broadcast %cst_8 : f32 to vector<64x8xf32>
    %11 = arith.maximumf %9, %10 : vector<64x8xf32>
    %cst_9 = arith.constant 0.000000e+00 : f32
    %12 = vector.broadcast %cst_9 : f32 to vector<1x10x8xf32>
    %cst_10 = arith.constant 0.000000e+00 : f32
    %13 = vector.broadcast %cst_10 : f32 to vector<8x1x8xf32>
    %c0_11 = arith.constant 0 : index
    %c0_12 = arith.constant 0 : index
    %c0_13 = arith.constant 0 : index
    %14 = vector.load %arg12[%c0_11, %c0_12, %c0_13] : memref<10x10x8xf32, #tpu.memory_space<vmem>>, vector<1x10x8xf32>
    tpu.vector_store %arg12[%c0_11, %c0_12, %c0_13], %12 {strides = array<i32>} : memref<10x10x8xf32, #tpu.memory_space<vmem>>, vector<1x10x8xf32>,
    %c9 = arith.constant 9 : index
    %c0_14 = arith.constant 0 : index
    %c0_15 = arith.constant 0 : index
    %15 = vector.load %arg12[%c9, %c0_14, %c0_15] : memref<10x10x8xf32, #tpu.memory_space<vmem>>, vector<1x10x8xf32>
    tpu.vector_store %arg12[%c9, %c0_14, %c0_15], %12 {strides = array<i32>} : memref<10x10x8xf32, #tpu.memory_space<vmem>>, vector<1x10x8xf32>,
    %c1 = arith.constant 1 : index
    %c0_16 = arith.constant 0 : index
    %c0_17 = arith.constant 0 : index
    %16 = vector.load %arg12[%c1, %c0_16, %c0_17] : memref<10x10x8xf32, #tpu.memory_space<vmem>>, vector<8x1x8xf32>
    tpu.vector_store %arg12[%c1, %c0_16, %c0_17], %13 {strides = array<i32>} : memref<10x10x8xf32, #tpu.memory_space<vmem>>, vector<8x1x8xf32>,
    %c1_18 = arith.constant 1 : index
    %c9_19 = arith.constant 9 : index
    %c0_20 = arith.constant 0 : index
    %17 = vector.load %arg12[%c1_18, %c9_19, %c0_20] : memref<10x10x8xf32, #tpu.memory_space<vmem>>, vector<8x1x8xf32>
    tpu.vector_store %arg12[%c1_18, %c9_19, %c0_20], %13 {strides = array<i32>} : memref<10x10x8xf32, #tpu.memory_space<vmem>>, vector<8x1x8xf32>,
    %18 = vector.shape_cast %11 : vector<64x8xf32> to vector<8x8x8xf32>
    %c1_21 = arith.constant 1 : index
    %c1_22 = arith.constant 1 : index
    %c0_23 = arith.constant 0 : index
    %19 = vector.load %arg12[%c1_21, %c1_22, %c0_23] : memref<10x10x8xf32, #tpu.memory_space<vmem>>, vector<8x8x8xf32>
    tpu.vector_store %arg12[%c1_21, %c1_22, %c0_23], %18 {strides = array<i32>} : memref<10x10x8xf32, #tpu.memory_space<vmem>>, vector<8x8x8xf32>,
    %c0_24 = arith.constant 0 : index
    %c0_25 = arith.constant 0 : index
    %c0_26 = arith.constant 0 : index
    %20 = vector.load %arg12[%c0_24, %c0_25, %c0_26] : memref<10x10x8xf32, #tpu.memory_space<vmem>>, vector<8x8x8xf32>
    %21 = vector.shape_cast %20 : vector<8x8x8xf32> to vector<64x8xf32>
    %c0_27 = arith.constant 0 : index
    %c0_28 = arith.constant 0 : index
    %22 = vector.load %arg13[%c0_27, %c0_28] : memref<64x72xf32, #tpu.memory_space<vmem>>, vector<64x8xf32>
    tpu.vector_store %arg13[%c0_27, %c0_28], %21 {strides = array<i32>} : memref<64x72xf32, #tpu.memory_space<vmem>>, vector<64x8xf32>,
    %c0_29 = arith.constant 0 : index
    %c1_30 = arith.constant 1 : index
    %c0_31 = arith.constant 0 : index
    %23 = vector.load %arg12[%c0_29, %c1_30, %c0_31] : memref<10x10x8xf32, #tpu.memory_space<vmem>>, vector<8x8x8xf32>
    %24 = vector.shape_cast %23 : vector<8x8x8xf32> to vector<64x8xf32>
    %c0_32 = arith.constant 0 : index
    %c8 = arith.constant 8 : index
    %25 = vector.load %arg13[%c0_32, %c8] : memref<64x72xf32, #tpu.memory_space<vmem>>, vector<64x8xf32>
    tpu.vector_store %arg13[%c0_32, %c8], %24 {strides = array<i32>} : memref<64x72xf32, #tpu.memory_space<vmem>>, vector<64x8xf32>,
    %c0_33 = arith.constant 0 : index
    %c2 = arith.constant 2 : index
    %c0_34 = arith.constant 0 : index
    %26 = vector.load %arg12[%c0_33, %c2, %c0_34] : memref<10x10x8xf32, #tpu.memory_space<vmem>>, vector<8x8x8xf32>
    %27 = vector.shape_cast %26 : vector<8x8x8xf32> to vector<64x8xf32>
    %c0_35 = arith.constant 0 : index
    %c16 = arith.constant 16 : index
    %28 = vector.load %arg13[%c0_35, %c16] : memref<64x72xf32, #tpu.memory_space<vmem>>, vector<64x8xf32>
    tpu.vector_store %arg13[%c0_35, %c16], %27 {strides = array<i32>} : memref<64x72xf32, #tpu.memory_space<vmem>>, vector<64x8xf32>,
    %c1_36 = arith.constant 1 : index
    %c0_37 = arith.constant 0 : index
    %c0_38 = arith.constant 0 : index
    %29 = vector.load %arg12[%c1_36, %c0_37, %c0_38] : memref<10x10x8xf32, #tpu.memory_space<vmem>>, vector<8x8x8xf32>
    %30 = vector.shape_cast %29 : vector<8x8x8xf32> to vector<64x8xf32>
    %c0_39 = arith.constant 0 : index
    %c24 = arith.constant 24 : index
    %31 = vector.load %arg13[%c0_39, %c24] : memref<64x72xf32, #tpu.memory_space<vmem>>, vector<64x8xf32>
    tpu.vector_store %arg13[%c0_39, %c24], %30 {strides = array<i32>} : memref<64x72xf32, #tpu.memory_space<vmem>>, vector<64x8xf32>,
    %c1_40 = arith.constant 1 : index
    %c1_41 = arith.constant 1 : index
    %c0_42 = arith.constant 0 : index
    %32 = vector.load %arg12[%c1_40, %c1_41, %c0_42] : memref<10x10x8xf32, #tpu.memory_space<vmem>>, vector<8x8x8xf32>
    %33 = vector.shape_cast %32 : vector<8x8x8xf32> to vector<64x8xf32>
    %c0_43 = arith.constant 0 : index
    %c32 = arith.constant 32 : index
    %34 = vector.load %arg13[%c0_43, %c32] : memref<64x72xf32, #tpu.memory_space<vmem>>, vector<64x8xf32>
    tpu.vector_store %arg13[%c0_43, %c32], %33 {strides = array<i32>} : memref<64x72xf32, #tpu.memory_space<vmem>>, vector<64x8xf32>,
    %c1_44 = arith.constant 1 : index
    %c2_45 = arith.constant 2 : index
    %c0_46 = arith.constant 0 : index
    %35 = vector.load %arg12[%c1_44, %c2_45, %c0_46] : memref<10x10x8xf32, #tpu.memory_space<vmem>>, vector<8x8x8xf32>
    %36 = vector.shape_cast %35 : vector<8x8x8xf32> to vector<64x8xf32>
    %c0_47 = arith.constant 0 : index
    %c40 = arith.constant 40 : index
    %37 = vector.load %arg13[%c0_47, %c40] : memref<64x72xf32, #tpu.memory_space<vmem>>, vector<64x8xf32>
    tpu.vector_store %arg13[%c0_47, %c40], %36 {strides = array<i32>} : memref<64x72xf32, #tpu.memory_space<vmem>>, vector<64x8xf32>,
    %c2_48 = arith.constant 2 : index
    %c0_49 = arith.constant 0 : index
    %c0_50 = arith.constant 0 : index
    %38 = vector.load %arg12[%c2_48, %c0_49, %c0_50] : memref<10x10x8xf32, #tpu.memory_space<vmem>>, vector<8x8x8xf32>
    %39 = vector.shape_cast %38 : vector<8x8x8xf32> to vector<64x8xf32>
    %c0_51 = arith.constant 0 : index
    %c48 = arith.constant 48 : index
    %40 = vector.load %arg13[%c0_51, %c48] : memref<64x72xf32, #tpu.memory_space<vmem>>, vector<64x8xf32>
    tpu.vector_store %arg13[%c0_51, %c48], %39 {strides = array<i32>} : memref<64x72xf32, #tpu.memory_space<vmem>>, vector<64x8xf32>,
    %c2_52 = arith.constant 2 : index
    %c1_53 = arith.constant 1 : index
    %c0_54 = arith.constant 0 : index
    %41 = vector.load %arg12[%c2_52, %c1_53, %c0_54] : memref<10x10x8xf32, #tpu.memory_space<vmem>>, vector<8x8x8xf32>
    %42 = vector.shape_cast %41 : vector<8x8x8xf32> to vector<64x8xf32>
    %c0_55 = arith.constant 0 : index
    %c56 = arith.constant 56 : index
    %43 = vector.load %arg13[%c0_55, %c56] : memref<64x72xf32, #tpu.memory_space<vmem>>, vector<64x8xf32>
    tpu.vector_store %arg13[%c0_55, %c56], %42 {strides = array<i32>} : memref<64x72xf32, #tpu.memory_space<vmem>>, vector<64x8xf32>,
    %c2_56 = arith.constant 2 : index
    %c2_57 = arith.constant 2 : index
    %c0_58 = arith.constant 0 : index
    %44 = vector.load %arg12[%c2_56, %c2_57, %c0_58] : memref<10x10x8xf32, #tpu.memory_space<vmem>>, vector<8x8x8xf32>
    %45 = vector.shape_cast %44 : vector<8x8x8xf32> to vector<64x8xf32>
    %c0_59 = arith.constant 0 : index
    %c64 = arith.constant 64 : index
    %46 = vector.load %arg13[%c0_59, %c64] : memref<64x72xf32, #tpu.memory_space<vmem>>, vector<64x8xf32>
    tpu.vector_store %arg13[%c0_59, %c64], %45 {strides = array<i32>} : memref<64x72xf32, #tpu.memory_space<vmem>>, vector<64x8xf32>,
    %c0_60 = arith.constant 0 : index
    %c0_61 = arith.constant 0 : index
    %47 = vector.load %arg13[%c0_60, %c0_61] : memref<64x72xf32, #tpu.memory_space<vmem>>, vector<64x72xf32>
    %c0_62 = arith.constant 0 : index
    %c0_63 = arith.constant 0 : index
    %48 = vector.load %arg5[%c0_62, %c0_63] : memref<72x8xf32, #tpu.memory_space<vmem>>, vector<72x8xf32>
    %cst_64 = arith.constant dense<0.000000e+00> : vector<64x8xf32>
    %49 = tpu.matmul %47, %48, %cst_64 {dimension_numbers = #tpu.dot_dimension_numbers<[1], [0], [0], [1], [0, 0, 1, 1], [], []>} : vector<64x72xf32>, vector<72x8xf32>, vector<64x8xf32> -> vector<64x8xf32>
    %c0_65 = arith.constant 0 : index
    %c0_66 = arith.constant 0 : index
    %50 = vector.load %arg6[%c0_65, %c0_66] : memref<1x8xf32, #tpu.memory_space<vmem>>, vector<1x8xf32>
    %51 = vector.broadcast %50 : vector<1x8xf32> to vector<64x8xf32>
    %52 = arith.mulf %49, %51 : vector<64x8xf32>
    %c0_67 = arith.constant 0 : index
    %c0_68 = arith.constant 0 : index
    %53 = vector.load %arg7[%c0_67, %c0_68] : memref<1x8xf32, #tpu.memory_space<vmem>>, vector<1x8xf32>
    %54 = vector.broadcast %53 : vector<1x8xf32> to vector<64x8xf32>
    %55 = arith.addf %52, %54 : vector<64x8xf32>
    %cst_69 = arith.constant 0.000000e+00 : f32
    %56 = vector.broadcast %cst_69 : f32 to vector<64x8xf32>
    %57 = arith.maximumf %55, %56 : vector<64x8xf32>
    %c0_70 = arith.constant 0 : index
    %c0_71 = arith.constant 0 : index
    %58 = vector.load %arg8[%c0_70, %c0_71] : memref<16x8xf32, #tpu.memory_space<vmem>>, vector<16x8xf32>
    %cst_72 = arith.constant dense<0.000000e+00> : vector<16x64xf32>
    %59 = tpu.matmul %58, %57, %cst_72 {dimension_numbers = #tpu.dot_dimension_numbers<[1], [1], [0], [0], [0, 0, 1, 0], [], []>} : vector<16x8xf32>, vector<64x8xf32>, vector<16x64xf32> -> vector<16x64xf32>
    %c0_73 = arith.constant 0 : index
    %c0_74 = arith.constant 0 : index
    %60 = vector.load %arg9[%c0_73, %c0_74] : memref<16x1xf32, #tpu.memory_space<vmem>>, vector<16x1xf32>
    %61 = vector.broadcast %60 : vector<16x1xf32> to vector<16x64xf32>
    %62 = arith.mulf %59, %61 : vector<16x64xf32>
    %c0_75 = arith.constant 0 : index
    %c0_76 = arith.constant 0 : index
    %63 = vector.load %arg10[%c0_75, %c0_76] : memref<16x1xf32, #tpu.memory_space<vmem>>, vector<16x1xf32>
    %64 = vector.broadcast %63 : vector<16x1xf32> to vector<16x64xf32>
    %65 = arith.addf %62, %64 : vector<16x64xf32>
    %66 = arith.addf %65, %1 : vector<16x64xf32>
    %cst_77 = arith.constant 0.000000e+00 : f32
    %67 = vector.broadcast %cst_77 : f32 to vector<16x64xf32>
    %68 = arith.maximumf %66, %67 : vector<16x64xf32>
    %c0_78 = arith.constant 0 : index
    %c0_79 = arith.constant 0 : index
    %c0_80 = arith.constant 0 : index
    %69 = vector.load %arg11[%c0_78, %c0_79, %c0_80] : memref<1x16x64xf32, #tpu.memory_space<vmem>>, vector<1x16x64xf32>
    %70 = vector.shape_cast %69 : vector<1x16x64xf32> to vector<16x64xf32>
    %71 = vector.shape_cast %68 : vector<16x64xf32> to vector<1x16x64xf32>
    tpu.vector_store %arg11[%c0_78, %c0_79, %c0_80], %71 {strides = array<i32>} : memref<1x16x64xf32, #tpu.memory_space<vmem>>, vector<1x16x64xf32>,
    return
  }
  func.func @transform_0(%arg0: i32) -> (i32, i32, i32) {
    %c0_i32 = arith.constant 0 : i32
    %c0_i32_0 = arith.constant 0 : i32
    %c0_i32_1 = arith.constant 0 : i32
    return %arg0, %c0_i32, %c0_i32_0 : i32, i32, i32
  }
  func.func @transform_1(%arg0: i32) -> (i32, i32) {
    %c0_i32 = arith.constant 0 : i32
    %c0_i32_0 = arith.constant 0 : i32
    %c0_i32_1 = arith.constant 0 : i32
    return %c0_i32, %c0_i32_0 : i32, i32
  }
  func.func @transform_2(%arg0: i32) -> (i32, i32) {
    %c0_i32 = arith.constant 0 : i32
    %c0_i32_0 = arith.constant 0 : i32
    %c0_i32_1 = arith.constant 0 : i32
    return %c0_i32, %c0_i32_0 : i32, i32
  }
  func.func @transform_3(%arg0: i32) -> (i32, i32) {
    %c0_i32 = arith.constant 0 : i32
    %c0_i32_0 = arith.constant 0 : i32
    %c0_i32_1 = arith.constant 0 : i32
    return %c0_i32, %c0_i32_0 : i32, i32
  }
  func.func @transform_4(%arg0: i32) -> (i32, i32) {
    %c0_i32 = arith.constant 0 : i32
    %c0_i32_0 = arith.constant 0 : i32
    %c0_i32_1 = arith.constant 0 : i32
    return %c0_i32, %c0_i32_0 : i32, i32
  }
  func.func @transform_5(%arg0: i32) -> (i32, i32) {
    %c0_i32 = arith.constant 0 : i32
    %c0_i32_0 = arith.constant 0 : i32
    %c0_i32_1 = arith.constant 0 : i32
    return %c0_i32, %c0_i32_0 : i32, i32
  }
  func.func @transform_6(%arg0: i32) -> (i32, i32) {
    %c0_i32 = arith.constant 0 : i32
    %c0_i32_0 = arith.constant 0 : i32
    %c0_i32_1 = arith.constant 0 : i32
    return %c0_i32, %c0_i32_0 : i32, i32
  }
  func.func @transform_7(%arg0: i32) -> (i32, i32) {
    %c0_i32 = arith.constant 0 : i32
    %c0_i32_0 = arith.constant 0 : i32
    %c0_i32_1 = arith.constant 0 : i32
    return %c0_i32, %c0_i32_0 : i32, i32
  }
  func.func @transform_8(%arg0: i32) -> (i32, i32) {
    %c0_i32 = arith.constant 0 : i32
    %c0_i32_0 = arith.constant 0 : i32
    %c0_i32_1 = arith.constant 0 : i32
    return %c0_i32, %c0_i32_0 : i32, i32
  }
  func.func @transform_9(%arg0: i32) -> (i32, i32) {
    %c0_i32 = arith.constant 0 : i32
    %c0_i32_0 = arith.constant 0 : i32
    %c0_i32_1 = arith.constant 0 : i32
    return %c0_i32, %c0_i32_0 : i32, i32
  }
  func.func @transform_10(%arg0: i32) -> (i32, i32, i32) {
    %c0_i32 = arith.constant 0 : i32
    %c0_i32_0 = arith.constant 0 : i32
    %c0_i32_1 = arith.constant 0 : i32
    return %arg0, %c0_i32, %c0_i32_0 : i32, i32, i32
  }
}

</mosaic_0001>

<bundles_post_ra>
// kernel: bottleneck_forward.1
= control target key start
LH: loop header
LB: loop body
LE: loop exit
PB: predicated region body
PF: predicated region fallthrough
CT: control target
= control target key end

     0   :  { %s1670_s13 = smov 0   ;;  %s2004_s0 = inlined_call_operand.vmem [shape: f32[2,16,64], index: 0, kind: input, shape index: {}]   ;;  %s2005_s1 = inlined_call_operand.vmem [shape: f32[16,8], index: 1, kind: input, shape index: {}]   ;;  %s2006_s2 = inlined_call_operand.vmem [shape: f32[1,8], index: 2, kind: input, shape index: {}]   ;;  %s2007_s3 = inlined_call_operand.vmem [shape: f32[1,8], index: 3, kind: input, shape index: {}]   ;;  %s2008_s4 = inlined_call_operand.vmem [shape: f32[72,8], index: 4, kind: input, shape index: {}]   ;;  %s2009_s5 = inlined_call_operand.vmem [shape: f32[1,8], index: 5, kind: input, shape index: {}]   ;;  %s2010_s6 = inlined_call_operand.vmem [shape: f32[1,8], index: 6, kind: input, shape index: {}]   ;;  %s2011_s7 = inlined_call_operand.vmem [shape: f32[16,8], index: 7, kind: input, shape index: {}]   ;;  %s2012_s8 = inlined_call_operand.vmem [shape: f32[16,1], index: 8, kind: input, shape index: {}]   ;;  %s2013_s9 = inlined_call_operand.vmem [shape: f32[16,1], index: 9, kind: input, shape index: {}]   ;;  %s2014_s10 = inlined_call_operand.vmem [shape: f32[2,16,64], index: 10, kind: output, shape index: {}]  }
   0x1 LB: > { %s1388_s14 = sadd.s32 4294967295, %s1603_s13   ;;  %p1392_p0 = scmp.ge.s32.totalorder %s1603_s13, 1  ;;  %s1603_s13 = sphi %s1670_s13, %s20_s13  }
   0x2   : > { %p312_p1 = scmp.lt.s32.totalorder %s1603_s13, 3 }
   0x4   : > { %p313_p2 = pnand %p1392_p0, %p312_p1 }
   0x5   : > { %p350_p3 = scmp.lt.s32.totalorder (!%p313_p2), %s1388_s14, 1  ;;  %v362_v0 = vld [vmem:[%s2005_s1] sm:$0xff] (!%p313_p2)  ;;  %v363_v1 = vld [vmem:[%s2005_s1 + $0x8] sm:$0xff] (!%p313_p2)  ;;  %vm396_vm0 = vcmask (!%p313_p2), 130048   ;;  %vm564_vm1 = vcmask (!%p313_p2), 64512   ;;  %vm566_vm2 = vcmask (!%p313_p2), 58368  }
   0x6   : > { %316 = sbr.rel (%p313_p2) target bundleno = 1102 (0x44e), region = 60  ;;  %v1533_v3 = vpack.c.bf16 (!%p313_p2), %v363_v1, %v362_v0  ;;  %v1605_v13 = vmov (!%p313_p2), 0.0   ;;  %vm572_vm3 = vcmask (!%p313_p2), 57344   ;;  %s1606_s23 = smov (!%p313_p2), 8   ;;  %vm653_vm4 = vcmask (!%p313_p2), 130112   ;;  %vm1970_vm13 = vmpackc.low (!%p313_p2), %vm564_vm1, %vm564_vm1 }
   0x7   : > { %565 = vst.msk [vmem:[#allocation2] sm:$0xff] (!%p313_p2), %vm564_vm1, %v1605_v13  ;;  %569 = vst.msk [vmem:[#allocation2 + $0x90] sm:$0xff] (!%p313_p2), %vm564_vm1, %v1605_v13  ;;  %s1607_s24 = smov (!%p313_p2), 48   ;;  %s1608_s25 = smov (!%p313_p2), 16   ;;  %v1405_v19 = vld [vmem:[%s2006_s2] ss:$0 sm:$0xff] (!%p313_p2) }
   0x8   : > { %1534 = vmatprep.subr.bf16.mxu1 (!%p313_p2), %v1533_v3  ;;  %567 = vst.msk [vmem:[#allocation2 + $0x8] sm:$0x3] (!%p313_p2), %vm566_vm2, %v1605_v13  ;;  %570 = vst.msk [vmem:[#allocation2 + $0x98] sm:$0x3] (!%p313_p2), %vm566_vm2, %v1605_v13  ;;  %v1406_v21 = vld [vmem:[%s2007_s3] ss:$0 sm:$0xff] (!%p313_p2) }
   0x9   : > { %1536 = vmatpush3.bf16.msra.mxu1 (!%p313_p2), %v1533_v3  ;;  %574 = vst.msk [vmem:[#allocation2 + $0x20] sm:$0x1] (!%p313_p2), %vm572_vm3, %v1605_v13  ;;  %573 = vst.msk [vmem:[#allocation2 + $0x10] sm:$0x1] (!%p313_p2), %vm572_vm3, %v1605_v13  ;;  %s1609_s30 = smov (!%p313_p2), 24   ;;  %s1610_s11 = smov (!%p313_p2), 32  }
   0xa   : > { %575 = vst.msk [vmem:[#allocation2 + $0x30] sm:$0x1] (!%p313_p2), %vm572_vm3, %v1605_v13  ;;  %576 = vst.msk [vmem:[#allocation2 + $0x40] sm:$0x1] (!%p313_p2), %vm572_vm3, %v1605_v13  ;;  %vm702_vm5 = vcmask (!%p313_p2), 195712   ;;  %s1611_s12 = smov (!%p313_p2), 40  }
   0xb   : > { %577 = vst.msk [vmem:[#allocation2 + $0x50] sm:$0x1] (!%p313_p2), %vm572_vm3, %v1605_v13  ;;  %578 = vst.msk [vmem:[#allocation2 + $0x60] sm:$0x1] (!%p313_p2), %vm572_vm3, %v1605_v13  ;;  %s1612_s16 = smov (!%p313_p2), 56   ;;  %s1613_s17 = smov (!%p313_p2), 64  }
   0xc   : > { %579 = vst.msk [vmem:[#allocation2 + $0x70] sm:$0x1] (!%p313_p2), %vm572_vm3, %v1605_v13  ;;  %580 = vst.msk [vmem:[#allocation2 + $0x80] sm:$0x1] (!%p313_p2), %vm572_vm3, %v1605_v13  ;;  %vm751_vm6 = vcmask (!%p313_p2), 261312   ;;  %vm800_vm7 = vcmask (!%p313_p2), 326912  }
   0xd   : > { %s2018_s14 = smov (!%p350_p3, %s1388_s14), 1  ;;  %581 = vst.msk [vmem:[#allocation2 + $0x19] sm:$0x1] %vm572_vm3, %v1605_v13  ;;  %582 = vst.msk [vmem:[#allocation2 + $0x29] sm:$0x1] %vm572_vm3, %v1605_v13  ;;  %vm899_vm8 = vcmask 458112  }
   0xe   : > { %s1429_s15 = sshll.u32 %s2018_s14, 4  ;;  %583 = vst.msk [vmem:[#allocation2 + $0x39] sm:$0x1] %vm572_vm3, %v1605_v13  ;;  %584 = vst.msk [vmem:[#allocation2 + $0x49] sm:$0x1] %vm572_vm3, %v1605_v13  ;;  %v866_v15 = vld [vmem:[#allocation2 + $0x90] sm:$0xff] }
   0xf   : > { %s354_s18 = scalar_lea.vmem %s2004_s0, %s1429_s15  ;;  %v613_v14 = vld [vmem:[#allocation2 + $0x1] sm:$0xff]  ;;  %585 = vst.msk [vmem:[#allocation2 + $0x59] sm:$0x1] %vm572_vm3, %v1605_v13  ;;  %586 = vst.msk [vmem:[#allocation2 + $0x69] sm:$0x1] %vm572_vm3, %v1605_v13  ;;  %vm849_vm9 = vcmask 392512  }
  0x10   : > { %v1692_v2 = vld [vmem:[%s354_s18] sm:$0xff]  ;;  %v1695_v4 = vld [vmem:[%s354_s18 + $0x8] sm:$0xff]  ;;  %629 = vrot.lane.b32.xlu1 %v613_v14, %s1606_s23  ;;  %587 = vst.msk [vmem:[#allocation2 + $0x79] sm:$0x1] %vm572_vm3, %v1605_v13  ;;  %588 = vst.msk [vmem:[#allocation2 + $0x89] sm:$0x1] %vm572_vm3, %v1605_v13 }
  0x11   : > { %364 = vxpose.xlu0.b32.start [1/2] (short) (narrow) %v1692_v2, 64  ;;  %v662_v16 = vld [vmem:[#allocation2 + $0x2] sm:$0xff]  ;;  %v1016_v13 = vld [vmem:[%s2008_s4 + $0x10] sm:$0xff]  ;;  %v1017_v14 = vld [vmem:[%s2008_s4 + $0x18] sm:$0xff]  ;;  %vm948_vm10 = vcmask 523712   ;;  %vm997_vm11 = vcmask 589312  }
  0x12   : > { %v597_v17 = vld [vmem:[#allocation2] sm:$0xff]  ;;  %vm1023_vm12 = vcmask 588800   ;;  %vm1330_vm14 = vcmask 523264  }
  0x13   : > { %605 = vst.msk [vmem:[#allocation3] sm:$0xff] %vm564_vm1, %v597_v17  ;;  %v1018_v17 = vld [vmem:[%s2008_s4 + $0x20] sm:$0xff] }
  0x14   : > { %889 = vrot.lane.b32.xlu1 %v866_v15, %s1607_s24  ;;  %v1541_v15 = vpack.c.bf16 %v1017_v14, %v1016_v13 }
  0x15   : > { %365 = vxpose.xlu0.b32.end [2/2] (short) (narrow) %v1695_v4, 64 }
  0x56   : > { %678 = vrot.lane.b32.xlu0 %v662_v16, %s1608_s25 }
  0x82   : > { %v630_v18 = vpop.permute.xlu1 %629 }
  0x83   : > { %654 = vst.msk [vmem:[#allocation3] sm:$0xff] %vm653_vm4, %v630_v18  ;;  %v1019_v18 = vld [vmem:[%s2008_s4 + $0x28] sm:$0xff] }
  0x91   : > { %v380_v5 = vpop.trf.xlu0 }
  0x92   : > { %1472 = vmatprep.mubr.msk.f32.mxu1 %vm396_vm0, %v380_v5 }
  0x95   : > { %v381_v6 = vpop.trf.xlu0 }
  0x96   : > { %1473 = vmatmul.mubr.msk.f32.vlgmr.msra.gmra.mrb[0].mxu1 %vm396_vm0, %v381_v6 }
  0x99   : > { %v382_v7 = vpop.trf.xlu0 }
  0x9a   : > { %1475 = vmatprep.mubr.msk.f32.mxu1 %vm396_vm0, %v382_v7 }
  0x9d   : > { %v383_v8 = vpop.trf.xlu0 }
  0x9e   : > { %1476 = vmatmul.mubr.msk.f32.gmra.mrb[2].mxu1 %vm396_vm0, %v383_v8 }
  0xa1   : > { %v384_v9 = vpop.trf.xlu0 }
  0xa2   : > { %1478 = vmatprep.mubr.msk.f32.mxu1 %vm396_vm0, %v384_v9 }
  0xa5   : > { %v385_v10 = vpop.trf.xlu0 }
  0xa6   : > { %1479 = vmatmul.mubr.msk.f32.gmra.mrb[4].mxu1 %vm396_vm0, %v385_v10  ;;  %v1014_v10 = vld [vmem:[%s2008_s4] sm:$0xff] }
  0xa9   : > { %v386_v11 = vpop.trf.xlu0 }
  0xaa   : > { %1481 = vmatprep.mubr.msk.f32.mxu1 %vm396_vm0, %v386_v11  ;;  %v1015_v11 = vld [vmem:[%s2008_s4 + $0x8] sm:$0xff] }
  0xad   : > { %v387_v12 = vpop.trf.xlu0 }
  0xae   : > { %1482 = vmatmul.mubr.msk.f32.gmra.mrb[6].mxu1 %vm396_vm0, %v387_v12  ;;  %v1537_v12 = vpack.c.bf16 %v1015_v11, %v1014_v10 }
  0xb0   : > { %1538 = vmatprep.subr.bf16.mxu1 %v1537_v12 }
  0xb1   : > { %1540 = vmatpush3.bf16.msra.mxu1 %v1537_v12 }
  0xb2   : > { %1542 = vmatprep.subr.bf16.mxu1 %v1541_v15 }
  0xb5   : > { %1544 = vmatpush3.bf16.msra.mxu1 %v1541_v15 }
  0xc8   : > { %v679_v50 = vpop.permute.xlu0 %678 }
  0xc9   : > { %703 = vst.msk [vmem:[#allocation3] sm:$0xff] %vm702_vm5, %v679_v50 }
 0x169   : > { %v1474_v20 = vpop.f32.mrb[0].mxu1 }
 0x16a   : > { %v534_v22 = vmul.f32 %v1474_v20, %v1405_v19  ;;  %v487_v23 = vpop.f32.mrb[1].mxu1  ;;  %v1020_v20 = vld [vmem:[%s2008_s4 + $0x30] sm:$0xff] }
 0x16b   : > { %v533_v24 = vmul.f32 %v1405_v19, %v487_v23 }
 0x16c   : > { %v549_v25 = vadd.f32 %v1406_v21, %v534_v22 }
 0x16d   : > { %v548_v26 = vadd.f32 %v1406_v21, %v533_v24  ;;  %v1022_v24 = vld [vmem:[%s2008_s4 + $0x40] sm:$0xff] }
 0x16e   : > { %v557_v27 = vmax.f32 %v549_v25, 0.0 }
 0x16f   : > { %v556_v28 = vmax.f32 %v548_v26, 0.0 }
 0x170   : > { %590 = vst.msk [vmem:[#allocation2 + $0x21] sm:$0xff] %vm564_vm1, %v557_v27 }
 0x171   : > { %589 = vst.msk [vmem:[#allocation2 + $0x11] sm:$0xff] %vm564_vm1, %v556_v28  ;;  %v1477_v29 = vpop.f32.mrb[2].mxu1 }
 0x172   : > { %v536_v30 = vmul.f32 %v1477_v29, %v1405_v19  ;;  %v497_v31 = vpop.f32.mrb[3].mxu1  ;;  %v1861_v29 = vpop.permute.xlu1 %889 }
 0x173   : > { %v535_v32 = vmul.f32 %v1405_v19, %v497_v31 }
 0x174   : > { %v551_v33 = vadd.f32 %v1406_v21, %v536_v30 }
 0x175   : > { %v550_v34 = vadd.f32 %v1406_v21, %v535_v32 }
 0x176   : > { %v559_v35 = vmax.f32 %v551_v33, 0.0 }
 0x177   : > { %v712_v36 = vld [vmem:[#allocation2 + $0x20] sm:$0xff]  ;;  %v558_v37 = vmax.f32 %v550_v34, 0.0 }
 0x178   : > { %729 = vrot.lane.b32.xlu1 %v712_v36, %s1609_s30  ;;  %592 = vst.msk [vmem:[#allocation2 + $0x41] sm:$0xff] %vm564_vm1, %v559_v35  ;;  %v1739_v38 = vld [vmem:[#allocation2 + $0x10] sm:$0xff]  ;;  %607 = vst.msk [vmem:[#allocation3 + $0x10] sm:$0xff] %vm564_vm1, %v712_v36  ;;  %v761_v42 = vld [vmem:[#allocation2 + $0x21] sm:$0xff] }
 0x179   : > { %591 = vst.msk [vmem:[#allocation2 + $0x31] sm:$0xff] %vm564_vm1, %v558_v37  ;;  %v1480_v39 = vpop.f32.mrb[4].mxu1  ;;  %606 = vst.msk [vmem:[#allocation3 + $0x8] sm:$0xff] %vm564_vm1, %v1739_v38  ;;  %v810_v47 = vld [vmem:[#allocation2 + $0x22] sm:$0xff]  ;;  %v614_v5 = vld [vmem:[#allocation2 + $0x11] sm:$0xff] }
 0x17a   : > { %v538_v40 = vmul.f32 %v1480_v39, %v1405_v19  ;;  %v507_v41 = vpop.f32.mrb[5].mxu1  ;;  %v663_v6 = vld [vmem:[#allocation2 + $0x12] sm:$0xff] }
 0x17b   : > { %v537_v43 = vmul.f32 %v1405_v19, %v507_v41 }
 0x17c   : > { %778 = vrot.lane.b32.xlu1 %v761_v42, %s1610_s11  ;;  %v553_v44 = vadd.f32 %v1406_v21, %v538_v40 }
 0x17d   : > { %v552_v45 = vadd.f32 %v1406_v21, %v537_v43 }
 0x17e   : > { %v561_v46 = vmax.f32 %v553_v44, 0.0  ;;  %v915_v44 = vld [vmem:[#allocation2 + $0x91] sm:$0xff] }
 0x17f   : > { %v1746_v48 = vld [vmem:[#allocation2 + $0x40] sm:$0xff]  ;;  %v560_v49 = vmax.f32 %v552_v45, 0.0 }
 0x180   : > { %827 = vrot.lane.b32.xlu1 %v810_v47, %s1611_s12  ;;  %879 = vrot.lane.b32.xlu0 %v1746_v48, %s1607_s24  ;;  %v1751_v51 = vld [vmem:[#allocation2 + $0x30] sm:$0xff]  ;;  %594 = vst.msk [vmem:[#allocation2 + $0x61] sm:$0xff] %vm564_vm1, %v561_v46  ;;  %609 = vst.msk [vmem:[#allocation3 + $0x20] sm:$0xff] %vm564_vm1, %v1746_v48  ;;  %v1757_v52 = vld [vmem:[#allocation2 + $0x41] sm:$0xff] }
 0x181   : > { %593 = vst.msk [vmem:[#allocation2 + $0x51] sm:$0xff] %vm564_vm1, %v560_v49  ;;  %v1483_v53 = vpop.f32.mrb[6].mxu1  ;;  %608 = vst.msk [vmem:[#allocation3 + $0x18] sm:$0xff] %vm564_vm1, %v1751_v51  ;;  %v959_v58 = vld [vmem:[#allocation2 + $0x42] sm:$0xff]  ;;  %v762_v1 = vld [vmem:[#allocation2 + $0x31] sm:$0xff] }
 0x182   : > { %v540_v54 = vmul.f32 %v1483_v53, %v1405_v19  ;;  %v517_v55 = vpop.f32.mrb[7].mxu1  ;;  %v811_v3 = vld [vmem:[#allocation2 + $0x32] sm:$0xff] }
 0x183   : > { %v539_v56 = vmul.f32 %v1405_v19, %v517_v55  ;;  %v1545_v19 = vpack.c.bf16 %v1019_v18, %v1018_v17 }
 0x184   : > { %875 = vrot.lane.b32.xlu1 %v712_v36, %s1607_s24  ;;  %928 = vrot.lane.b32.xlu0 %v1757_v52, %s1612_s16  ;;  %v555_v57 = vadd.f32 %v1406_v21, %v540_v54 }
 0x185   : > { %v554_v59 = vadd.f32 %v1406_v21, %v539_v56  ;;  %1546 = vmatprep.subr.bf16.mxu1 %v1545_v19  ;;  %v1021_v21 = vld [vmem:[%s2008_s4 + $0x38] sm:$0xff] }
 0x186   : > { %v563_v60 = vmax.f32 %v555_v57, 0.0  ;;  %1548 = vmatpush3.bf16.msra.mxu1 %v1545_v19  ;;  %v1549_v22 = vpack.c.bf16 %v1021_v21, %v1020_v20 }
 0x187   : > { %v1765_v61 = vld [vmem:[#allocation2 + $0x60] sm:$0xff]  ;;  %v562_v62 = vmax.f32 %v554_v59, 0.0 }
 0x188   : > { %924 = vrot.lane.b32.xlu1 %v761_v42, %s1612_s16  ;;  %977 = vrot.lane.b32.xlu0 %v959_v58, %s1613_s17  ;;  %v1769_v63 = vld [vmem:[#allocation2 + $0x50] sm:$0xff]  ;;  %596 = vst.msk [vmem:[#allocation2 + $0x81] sm:$0xff] %vm564_vm1, %v563_v60  ;;  %611 = vst.msk [vmem:[#allocation3 + $0x30] sm:$0xff] %vm564_vm1, %v1765_v61  ;;  %v912_v7 = vld [vmem:[#allocation2 + $0x61] sm:$0xff] }
 0x189   : > { %595 = vst.msk [vmem:[#allocation2 + $0x71] sm:$0xff] %vm564_vm1, %v562_v62  ;;  %610 = vst.msk [vmem:[#allocation3 + $0x28] sm:$0xff] %vm564_vm1, %v1769_v63  ;;  %v961_v8 = vld [vmem:[#allocation2 + $0x62] sm:$0xff]  ;;  %v960_v9 = vld [vmem:[#allocation2 + $0x52] sm:$0xff]  ;;  %1550 = vmatprep.subr.bf16.mxu1 %v1549_v22 }
 0x18a   : > { %v764_v16 = vld [vmem:[#allocation2 + $0x51] sm:$0xff]  ;;  %1552 = vmatpush3.bf16.msra.mxu1 %v1549_v22 }
 0x18b   : > { %1500 = vmatprep.subr.mxu1 %v1022_v24 }
 0x18c   : > { %973 = vrot.lane.b32.xlu1 %v810_v47, %s1613_s17  ;;  %686 = vrot.lane.b32.xlu0 %v959_v58, %s1608_s25 }
 0x18e   : > { %1501 = vmatpush3.msra.mxu1 %v1022_v24 }
 0x18f   : > { %v865_v23 = vld [vmem:[#allocation2 + $0x80] sm:$0xff] }
 0x190   : > { %633 = vrot.lane.b32.xlu1 %v761_v42, %s1606_s23  ;;  %731 = vrot.lane.b32.xlu0 %v1751_v51, %s1609_s30  ;;  %v1782_v0 = vld [vmem:[#allocation2 + $0x70] sm:$0xff]  ;;  %v914_v25 = vld [vmem:[#allocation2 + $0x81] sm:$0xff] }
 0x191   : > { %612 = vst.msk [vmem:[#allocation3 + $0x38] sm:$0xff] %vm564_vm1, %v1782_v0  ;;  %v962_v26 = vld [vmem:[#allocation2 + $0x72] sm:$0xff]  ;;  %v963_v28 = vld [vmem:[#allocation2 + $0x82] sm:$0xff] }
 0x192   : > { %v766_v27 = vld [vmem:[#allocation2 + $0x71] sm:$0xff] }
 0x194   : > { %682 = vrot.lane.b32.xlu1 %v810_v47, %s1608_s25  ;;  %780 = vrot.lane.b32.xlu0 %v762_v1, %s1610_s11  ;;  %v964_v47 = vld [vmem:[#allocation2 + $0x92] sm:$0xff] }
 0x198   : > { %631 = vrot.lane.b32.xlu1 %v614_v5, %s1606_s23  ;;  %829 = vrot.lane.b32.xlu0 %v811_v3, %s1611_s12 }
 0x19c   : > { %680 = vrot.lane.b32.xlu1 %v663_v6, %s1608_s25  ;;  %883 = vrot.lane.b32.xlu0 %v1765_v61, %s1607_s24 }
 0x1a0   : > { %727 = vrot.lane.b32.xlu1 %v1739_v38, %s1609_s30  ;;  %932 = vrot.lane.b32.xlu0 %v912_v7, %s1612_s16 }
 0x1a4   : > { %776 = vrot.lane.b32.xlu1 %v614_v5, %s1610_s11  ;;  %981 = vrot.lane.b32.xlu0 %v961_v8, %s1613_s17 }
 0x1a8   : > { %825 = vrot.lane.b32.xlu1 %v663_v6, %s1611_s12  ;;  %690 = vrot.lane.b32.xlu0 %v961_v8, %s1608_s25 }
 0x1ac   : > { %733 = vrot.lane.b32.xlu1 %v1746_v48, %s1609_s30  ;;  %979 = vrot.lane.b32.xlu0 %v960_v9, %s1613_s17 }
 0x1b0   : > { %782 = vrot.lane.b32.xlu1 %v1757_v52, %s1610_s11  ;;  %735 = vrot.lane.b32.xlu0 %v1769_v63, %s1609_s30 }
 0x1b4   : > { %831 = vrot.lane.b32.xlu1 %v959_v58, %s1611_s12  ;;  %784 = vrot.lane.b32.xlu0 %v764_v16, %s1610_s11 }
 0x1b8   : > { %637 = vrot.lane.b32.xlu1 %v1757_v52, %s1606_s23  ;;  %833 = vrot.lane.b32.xlu0 %v960_v9, %s1611_s12 }
 0x1bc   : > { %877 = vrot.lane.b32.xlu1 %v1751_v51, %s1607_s24  ;;  %887 = vrot.lane.b32.xlu0 %v865_v23, %s1607_s24 }
 0x1c0   : > { %926 = vrot.lane.b32.xlu1 %v762_v1, %s1612_s16  ;;  %936 = vrot.lane.b32.xlu0 %v914_v25, %s1612_s16 }
 0x1c4   : > { %975 = vrot.lane.b32.xlu1 %v811_v3, %s1613_s17  ;;  %983 = vrot.lane.b32.xlu0 %v962_v26, %s1613_s17 }
 0x1c8   : > { %635 = vrot.lane.b32.xlu1 %v762_v1, %s1606_s23  ;;  %739 = vrot.lane.b32.xlu0 %v1782_v0, %s1609_s30 }
 0x1cc   : > { %684 = vrot.lane.b32.xlu1 %v811_v3, %s1608_s25  ;;  %788 = vrot.lane.b32.xlu0 %v766_v27, %s1610_s11 }
 0x1d0   : > { %737 = vrot.lane.b32.xlu1 %v1765_v61, %s1609_s30  ;;  %837 = vrot.lane.b32.xlu0 %v962_v26, %s1611_s12 }
 0x1d4   : > { %786 = vrot.lane.b32.xlu1 %v912_v7, %s1610_s11  ;;  %985 = vrot.lane.b32.xlu0 %v963_v28, %s1613_s17 }
 0x1d8   : > { %835 = vrot.lane.b32.xlu1 %v961_v8, %s1611_s12 }
 0x1dc   : > { %641 = vrot.lane.b32.xlu1 %v912_v7, %s1606_s23 }
 0x1e0   : > { %881 = vrot.lane.b32.xlu1 %v1769_v63, %s1607_s24 }
 0x1e4   : > { %930 = vrot.lane.b32.xlu1 %v764_v16, %s1612_s16 }
 0x1e8   : > { %639 = vrot.lane.b32.xlu1 %v764_v16, %s1606_s23 }
 0x1ea   : > { %v730_v30 = vpop.permute.xlu1 %729 }
 0x1ec   : > { %688 = vrot.lane.b32.xlu1 %v960_v9, %s1608_s25 }
 0x1ee   : > { %v779_v31 = vpop.permute.xlu1 %778 }
 0x1f0   : > { %741 = vrot.lane.b32.xlu1 %v865_v23, %s1609_s30 }
 0x1f2   : > { %v828_v32 = vpop.permute.xlu1 %827  ;;  %v880_v33 = vpop.permute.xlu0 %879 }
 0x1f4   : > { %790 = vrot.lane.b32.xlu1 %v914_v25, %s1610_s11 }
 0x1f6   : > { %v876_v34 = vpop.permute.xlu1 %875  ;;  %v929_v35 = vpop.permute.xlu0 %928 }
 0x1f8   : > { %839 = vrot.lane.b32.xlu1 %v963_v28, %s1611_s12 }
 0x1fa   : > { %v925_v36 = vpop.permute.xlu1 %924  ;;  %v978_v37 = vpop.permute.xlu0 %977 }
 0x1fc   : > { %885 = vrot.lane.b32.xlu1 %v1782_v0, %s1607_s24  ;;  %s359_s24 = scalar_lea.vmem %s2014_s10, %s1429_s15 }
 0x1fe   : > { %v974_v38 = vpop.permute.xlu1 %973  ;;  %v687_v39 = vpop.permute.xlu0 %686 }
 0x200   : > { %934 = vrot.lane.b32.xlu1 %v766_v27, %s1612_s16 }
 0x202   : > { %v634_v40 = vpop.permute.xlu1 %633  ;;  %v732_v41 = vpop.permute.xlu0 %731 }
 0x203   : > { %656 = vst.msk [vmem:[#allocation3 + $0x10] sm:$0xff] %vm653_vm4, %v634_v40  ;;  %v1191_v40 = vld [vmem:[%s2011_s7] sm:$0xff] }
 0x204   : > { %643 = vrot.lane.b32.xlu1 %v766_v27, %s1606_s23  ;;  %1530 = vmatprep.mubr.msk.f32.mxu0 %vm564_vm1, %v1191_v40 }
 0x206   : > { %v683_v42 = vpop.permute.xlu1 %682  ;;  %v781_v43 = vpop.permute.xlu0 %780 }
 0x207   : > { %705 = vst.msk [vmem:[#allocation3 + $0x10] sm:$0xff] %vm702_vm5, %v683_v42  ;;  %v1614_v42 = vmov 0  }
 0x208   : > { %692 = vrot.lane.b32.xlu1 %v962_v26, %s1608_s25  ;;  %754 = vst.msk [vmem:[#allocation3 + $0x10] sm:$0xff] %vm751_vm6, %v732_v41  ;;  %v1298_v41 = vld [vmem:[%s2012_s8] sm:$0xff]  ;;  %1595 = vset.pattern.permute.xlu0 %v1614_v42 }
 0x209   : > { %803 = vst.msk [vmem:[#allocation3 + $0x10] sm:$0xff] %vm800_vm7, %v781_v43  ;;  %1596 = vset.pattern.permute.xlu1 %v1614_v42  ;;  %1302 = vperm.xlu0 %1595, %v1298_v41   ;;  %v1313_v43 = vld [vmem:[%s2013_s9 + $0x8] sm:$0xff] }
 0x20a   : > { %v632_v45 = vpop.permute.xlu1 %631  ;;  %v830_v46 = vpop.permute.xlu0 %829 }
 0x20b   : > { %655 = vst.msk [vmem:[#allocation3 + $0x8] sm:$0xff] %vm653_vm4, %v632_v45  ;;  %v1415_v45 = vld [vmem:[%s2009_s5] ss:$0 sm:$0xff] }
 0x20c   : > { %852 = vst.msk [vmem:[#allocation3 + $0x10] sm:$0xff] %vm849_vm9, %v830_v46  ;;  %938 = vrot.lane.b32.xlu1 %v915_v44, %s1612_s16  ;;  %v1312_v44 = vld [vmem:[%s2013_s9] sm:$0xff] }
 0x20d   : > { %902 = vst.msk [vmem:[#allocation3 + $0x10] sm:$0xff] %vm899_vm8, %v880_v33  ;;  %1321 = vperm.xlu0 %1595, %v1313_v43  }
 0x20e   : > { %951 = vst.msk [vmem:[#allocation3 + $0x10] sm:$0xff] %vm948_vm10, %v929_v35  ;;  %v681_v48 = vpop.permute.xlu1 %680  ;;  %v884_v49 = vpop.permute.xlu0 %883 }
 0x20f   : > { %1000 = vst.msk [vmem:[#allocation3 + $0x10] sm:$0xff] %vm997_vm11, %v978_v37 }
 0x210   : > { %704 = vst.msk [vmem:[#allocation3 + $0x8] sm:$0xff] %vm702_vm5, %v681_v48  ;;  %987 = vrot.lane.b32.xlu1 %v964_v47, %s1613_s17  ;;  %v1416_v47 = vld [vmem:[%s2010_s6] ss:$0 sm:$0xff] }
 0x211   : > { %753 = vst.msk [vmem:[#allocation3 + $0x8] sm:$0xff] %vm751_vm6, %v730_v30 }
 0x212   : > { %802 = vst.msk [vmem:[#allocation3 + $0x8] sm:$0xff] %vm800_vm7, %v779_v31  ;;  %v728_v50 = vpop.permute.xlu1 %727  ;;  %v933_v51 = vpop.permute.xlu0 %932 }
 0x213   : > { %851 = vst.msk [vmem:[#allocation3 + $0x8] sm:$0xff] %vm849_vm9, %v828_v32 }
 0x214   : > { %752 = vst.msk [vmem:[#allocation3] sm:$0xff] %vm751_vm6, %v728_v50 }
 0x216   : > { %v777_v52 = vpop.permute.xlu1 %776  ;;  %v982_v53 = vpop.permute.xlu0 %981  ;;  %v1008_v12 = vld [vmem:[#allocation3 + $0x10] sm:$0xff] }
 0x217   : > { %801 = vst.msk [vmem:[#allocation3] sm:$0xff] %vm800_vm7, %v777_v52 }
 0x21a   : > { %v826_v54 = vpop.permute.xlu1 %825  ;;  %v691_v55 = vpop.permute.xlu0 %690 }
 0x21b   : > { %850 = vst.msk [vmem:[#allocation3] sm:$0xff] %vm849_vm9, %v826_v54 }
 0x21c   : > { %900 = vst.msk [vmem:[#allocation3] sm:$0xff] %vm899_vm8, %v876_v34 }
 0x21d   : > { %949 = vst.msk [vmem:[#allocation3] sm:$0xff] %vm948_vm10, %v925_v36 }
 0x21e   : > { %998 = vst.msk [vmem:[#allocation3] sm:$0xff] %vm997_vm11, %v974_v38  ;;  %v734_v56 = vpop.permute.xlu1 %733  ;;  %v980_v57 = vpop.permute.xlu0 %979 }
 0x222   : > { %v783_v58 = vpop.permute.xlu1 %782  ;;  %v736_v59 = vpop.permute.xlu0 %735 }
 0x225   : > { %v1006_v60 = vld [vmem:[#allocation3] sm:$0xff] }
 0x226   : > { %v832_v61 = vpop.permute.xlu1 %831  ;;  %1502 = vmatprep.mubr.msk.f32.mxu1 %vm1023_vm12, %v1006_v60  ;;  %v785_v62 = vpop.permute.xlu0 %784 }
 0x22a   : > { %v638_v63 = vpop.permute.xlu1 %637  ;;  %v834_v0 = vpop.permute.xlu0 %833 }
 0x22b   : > { %658 = vst.msk [vmem:[#allocation3 + $0x20] sm:$0xff] %vm653_vm4, %v638_v63 }
 0x22c   : > { %707 = vst.msk [vmem:[#allocation3 + $0x20] sm:$0xff] %vm702_vm5, %v687_v39 }
 0x22d   : > { %756 = vst.msk [vmem:[#allocation3 + $0x20] sm:$0xff] %vm751_vm6, %v736_v59 }
 0x22e   : > { %v878_v1 = vpop.permute.xlu1 %877  ;;  %805 = vst.msk [vmem:[#allocation3 + $0x20] sm:$0xff] %vm800_vm7, %v785_v62  ;;  %v888_v3 = vpop.permute.xlu0 %887 }
 0x22f   : > { %901 = vst.msk [vmem:[#allocation3 + $0x8] sm:$0xff] %vm899_vm8, %v878_v1 }
 0x230   : > { %854 = vst.msk [vmem:[#allocation3 + $0x20] sm:$0xff] %vm849_vm9, %v834_v0 }
 0x231   : > { %904 = vst.msk [vmem:[#allocation3 + $0x20] sm:$0xff] %vm899_vm8, %v884_v49 }
 0x232   : > { %953 = vst.msk [vmem:[#allocation3 + $0x20] sm:$0xff] %vm948_vm10, %v933_v51  ;;  %v927_v5 = vpop.permute.xlu1 %926  ;;  %v937_v6 = vpop.permute.xlu0 %936 }
 0x233   : > { %1002 = vst.msk [vmem:[#allocation3 + $0x20] sm:$0xff] %vm997_vm11, %v982_v53 }
 0x234   : > { %950 = vst.msk [vmem:[#allocation3 + $0x8] sm:$0xff] %vm948_vm10, %v927_v5 }
 0x236   : > { %v976_v7 = vpop.permute.xlu1 %975  ;;  %v984_v9 = vpop.permute.xlu0 %983 }
 0x237   : > { %999 = vst.msk [vmem:[#allocation3 + $0x8] sm:$0xff] %vm997_vm11, %v976_v7 }
 0x23a   : > { %v636_v8 = vpop.permute.xlu1 %635  ;;  %v740_v13 = vpop.permute.xlu0 %739  ;;  %v1010_v26 = vld [vmem:[#allocation3 + $0x20] sm:$0xff] }
 0x23b   : > { %657 = vst.msk [vmem:[#allocation3 + $0x18] sm:$0xff] %vm653_vm4, %v636_v8 }
 0x23e   : > { %v685_v10 = vpop.permute.xlu1 %684  ;;  %v1007_v11 = vld [vmem:[#allocation3 + $0x8] sm:$0xff]  ;;  %v789_v16 = vpop.permute.xlu0 %788 }
 0x23f   : > { %706 = vst.msk [vmem:[#allocation3 + $0x18] sm:$0xff] %vm702_vm5, %v685_v10  ;;  %1503 = vmatmul.mubr.msk.f32.vlgmr.msra.gmra.mrb[8].mxu1 %vm1023_vm12, %v1007_v11 }
 0x240   : > { %755 = vst.msk [vmem:[#allocation3 + $0x18] sm:$0xff] %vm751_vm6, %v734_v56  ;;  %1505 = vmatprep.mubr.msk.f32.mxu1 %vm1023_vm12, %v1008_v12 }
 0x241   : > { %804 = vst.msk [vmem:[#allocation3 + $0x18] sm:$0xff] %vm800_vm7, %v783_v58 }
 0x242   : > { %853 = vst.msk [vmem:[#allocation3 + $0x18] sm:$0xff] %vm849_vm9, %v832_v61  ;;  %v738_v14 = vpop.permute.xlu1 %737  ;;  %v838_v18 = vpop.permute.xlu0 %837 }
 0x246   : > { %v787_v15 = vpop.permute.xlu1 %786  ;;  %v986_v21 = vpop.permute.xlu0 %985 }
 0x24a   : > { %v836_v17 = vpop.permute.xlu1 %835 }
 0x24e   : > { %v642_v19 = vpop.permute.xlu1 %641 }
 0x24f   : > { %660 = vst.msk [vmem:[#allocation3 + $0x30] sm:$0xff] %vm653_vm4, %v642_v19 }
 0x250   : > { %709 = vst.msk [vmem:[#allocation3 + $0x30] sm:$0xff] %vm702_vm5, %v691_v55 }
 0x251   : > { %758 = vst.msk [vmem:[#allocation3 + $0x30] sm:$0xff] %vm751_vm6, %v740_v13 }
 0x252   : > { %v882_v20 = vpop.permute.xlu1 %881  ;;  %807 = vst.msk [vmem:[#allocation3 + $0x30] sm:$0xff] %vm800_vm7, %v789_v16 }
 0x253   : > { %903 = vst.msk [vmem:[#allocation3 + $0x18] sm:$0xff] %vm899_vm8, %v882_v20 }
 0x254   : > { %856 = vst.msk [vmem:[#allocation3 + $0x30] sm:$0xff] %vm849_vm9, %v838_v18 }
 0x255   : > { %906 = vst.msk [vmem:[#allocation3 + $0x30] sm:$0xff] %vm899_vm8, %v888_v3 }
 0x256   : > { %955 = vst.msk [vmem:[#allocation3 + $0x30] sm:$0xff] %vm948_vm10, %v937_v6  ;;  %v931_v22 = vpop.permute.xlu1 %930 }
 0x257   : > { %1004 = vst.msk [vmem:[#allocation3 + $0x30] sm:$0xff] %vm997_vm11, %v986_v21 }
 0x258   : > { %952 = vst.msk [vmem:[#allocation3 + $0x18] sm:$0xff] %vm948_vm10, %v931_v22  ;;  %v1192_v22 = vld [vmem:[%s2011_s7 + $0x8] sm:$0xff] }
 0x259   : > { %1001 = vst.msk [vmem:[#allocation3 + $0x18] sm:$0xff] %vm997_vm11, %v980_v57 }
 0x25a   : > { %v640_v23 = vpop.permute.xlu1 %639 }
 0x25b   : > { %659 = vst.msk [vmem:[#allocation3 + $0x28] sm:$0xff] %vm653_vm4, %v640_v23 }
 0x25e   : > { %v689_v24 = vpop.permute.xlu1 %688  ;;  %v1012_v36 = vld [vmem:[#allocation3 + $0x30] sm:$0xff] }
 0x25f   : > { %708 = vst.msk [vmem:[#allocation3 + $0x28] sm:$0xff] %vm702_vm5, %v689_v24 }
 0x260   : > { %v1009_v25 = vld [vmem:[#allocation3 + $0x18] sm:$0xff]  ;;  %757 = vst.msk [vmem:[#allocation3 + $0x28] sm:$0xff] %vm751_vm6, %v738_v14 }
 0x261   : > { %1506 = vmatmul.mubr.msk.f32.gmra.mrb[10].mxu1 %vm1023_vm12, %v1009_v25  ;;  %806 = vst.msk [vmem:[#allocation3 + $0x28] sm:$0xff] %vm800_vm7, %v787_v15 }
 0x262   : > { %1508 = vmatprep.mubr.msk.f32.mxu1 %vm1023_vm12, %v1010_v26  ;;  %855 = vst.msk [vmem:[#allocation3 + $0x28] sm:$0xff] %vm849_vm9, %v836_v17  ;;  %v742_v27 = vpop.permute.xlu1 %741 }
 0x266   : > { %v791_v28 = vpop.permute.xlu1 %790 }
 0x26a   : > { %v840_v30 = vpop.permute.xlu1 %839 }
 0x26e   : > { %v886_v31 = vpop.permute.xlu1 %885 }
 0x26f   : > { %905 = vst.msk [vmem:[#allocation3 + $0x28] sm:$0xff] %vm899_vm8, %v886_v31 }
 0x272   : > { %v935_v32 = vpop.permute.xlu1 %934 }
 0x273   : > { %954 = vst.msk [vmem:[#allocation3 + $0x28] sm:$0xff] %vm948_vm10, %v935_v32 }
 0x274   : > { %1003 = vst.msk [vmem:[#allocation3 + $0x28] sm:$0xff] %vm997_vm11, %v984_v9 }
 0x276   : > { %v644_v33 = vpop.permute.xlu1 %643 }
 0x277   : > { %661 = vst.msk [vmem:[#allocation3 + $0x38] sm:$0xff] %vm653_vm4, %v644_v33 }
 0x27a   : > { %v693_v34 = vpop.permute.xlu1 %692 }
 0x27b   : > { %710 = vst.msk [vmem:[#allocation3 + $0x38] sm:$0xff] %vm702_vm5, %v693_v34  ;;  %v1011_v35 = vld [vmem:[#allocation3 + $0x28] sm:$0xff] }
 0x27c   : > { %759 = vst.msk [vmem:[#allocation3 + $0x38] sm:$0xff] %vm751_vm6, %v742_v27  ;;  %1509 = vmatmul.mubr.msk.f32.gmra.mrb[12].mxu1 %vm1023_vm12, %v1011_v35 }
 0x27d   : > { %808 = vst.msk [vmem:[#allocation3 + $0x38] sm:$0xff] %vm800_vm7, %v791_v28  ;;  %1511 = vmatprep.mubr.msk.f32.mxu1 %vm1023_vm12, %v1012_v36 }
 0x27e   : > { %857 = vst.msk [vmem:[#allocation3 + $0x38] sm:$0xff] %vm849_vm9, %v840_v30  ;;  %v939_v37 = vpop.permute.xlu1 %938 }
 0x27f   : > { %907 = vst.msk [vmem:[#allocation3 + $0x38] sm:$0xff] %vm899_vm8, %v1861_v29  ;;  %v1299_v29 = vld [vmem:[%s2012_s8 + $0x8] sm:$0xff] }
 0x280   : > { %956 = vst.msk [vmem:[#allocation3 + $0x38] sm:$0xff] %vm948_vm10, %v939_v37  ;;  %1307 = vperm.xlu1 %1596, %v1299_v29  }
 0x282   : > { %v988_v38 = vpop.permute.xlu1 %987 }
 0x283   : > { %1005 = vst.msk [vmem:[#allocation3 + $0x38] sm:$0xff] %vm997_vm11, %v988_v38 }
 0x284   : > { %1316 = vperm.xlu1 %1596, %v1312_v44  }
 0x288   : > { %v1303_v23 = vpop.permute.xlu0 %1302 }
 0x28a   : > { %v1013_v39 = vld [vmem:[#allocation3 + $0x38] sm:$0xff] }
 0x28b   : > { %1512 = vmatmul.mubr.msk.f32.gmra.mrb[14].mxu1 %vm1023_vm12, %v1013_v39 }
 0x28c   : > { %v1322_v28 = vpop.permute.xlu0 %1321 }
 0x2ff   : > { %v1308_v24 = vpop.permute.xlu1 %1307 }
 0x303   : > { %v1317_v31 = vpop.permute.xlu1 %1316 }
 0x312   : > { %v1504_v46 = vpop.f32.mrb[8].mxu1 }
 0x313   : > { %v1161_v48 = vmul.f32 %v1504_v46, %v1415_v45  ;;  %v1114_v49 = vpop.f32.mrb[9].mxu1 }
 0x314   : > { %v1160_v50 = vmul.f32 %v1415_v45, %v1114_v49 }
 0x315   : > { %v1176_v51 = vadd.f32 %v1416_v47, %v1161_v48 }
 0x316   : > { %v1175_v52 = vadd.f32 %v1416_v47, %v1160_v50 }
 0x317   : > { %v1184_v53 = vmax.f32 %v1176_v51, 0.0 }
 0x318   : > { %v1183_v54 = vmax.f32 %v1175_v52, 0.0 }
 0x31a   : > { %v1553_v56 = vpack.c.bf16 %v1184_v53, %v1183_v54 }
 0x31c   : > { %1555 = vmatprep.subr.msk.bf16.mxu0 %vm1970_vm13, %v1553_v56 }
 0x31d   : > { %1558 = vmatpush3.bf16.xpose.msk.msra.mxu0 %vm1970_vm13, %v1553_v56 }
 0x334   : > { %v1507_v57 = vpop.f32.mrb[10].mxu1 }
 0x335   : > { %v1163_v58 = vmul.f32 %v1507_v57, %v1415_v45  ;;  %v1124_v59 = vpop.f32.mrb[11].mxu1 }
 0x336   : > { %v1162_v60 = vmul.f32 %v1415_v45, %v1124_v59 }
 0x337   : > { %v1178_v61 = vadd.f32 %v1416_v47, %v1163_v58 }
 0x338   : > { %v1177_v62 = vadd.f32 %v1416_v47, %v1162_v60 }
 0x339   : > { %v1186_v63 = vmax.f32 %v1178_v61, 0.0 }
 0x33a   : > { %v1185_v0 = vmax.f32 %v1177_v62, 0.0 }
 0x33c   : > { %v1559_v1 = vpack.c.bf16 %v1186_v63, %v1185_v0 }
 0x33e   : > { %1561 = vmatprep.subr.msk.bf16.mxu0 %vm1970_vm13, %v1559_v1 }
 0x33f   : > { %1564 = vmatpush3.bf16.xpose.msk.msra.mxu0 %vm1970_vm13, %v1559_v1 }
 0x34f   : > { %v1510_v3 = vpop.f32.mrb[12].mxu1 }
 0x350   : > { %v1165_v5 = vmul.f32 %v1510_v3, %v1415_v45  ;;  %v1134_v6 = vpop.f32.mrb[13].mxu1 }
 0x351   : > { %v1164_v7 = vmul.f32 %v1415_v45, %v1134_v6 }
 0x352   : > { %v1180_v8 = vadd.f32 %v1416_v47, %v1165_v5 }
 0x353   : > { %v1179_v9 = vadd.f32 %v1416_v47, %v1164_v7 }
 0x354   : > { %v1188_v10 = vmax.f32 %v1180_v8, 0.0 }
 0x355   : > { %v1187_v11 = vmax.f32 %v1179_v9, 0.0 }
 0x357   : > { %v1565_v12 = vpack.c.bf16 %v1188_v10, %v1187_v11 }
 0x359   : > { %1567 = vmatprep.subr.msk.bf16.mxu0 %vm1970_vm13, %v1565_v12 }
 0x35a   : > { %1570 = vmatpush3.bf16.xpose.msk.msra.mxu0 %vm1970_vm13, %v1565_v12 }
 0x35e   : > { %v1513_v13 = vpop.f32.mrb[14].mxu1 }
 0x35f   : > { %v1167_v14 = vmul.f32 %v1513_v13, %v1415_v45  ;;  %v1144_v15 = vpop.f32.mrb[15].mxu1 }
 0x360   : > { %v1166_v16 = vmul.f32 %v1415_v45, %v1144_v15 }
 0x361   : > { %v1182_v17 = vadd.f32 %v1416_v47, %v1167_v14 }
 0x362   : > { %v1181_v18 = vadd.f32 %v1416_v47, %v1166_v16 }
 0x363   : > { %v1190_v19 = vmax.f32 %v1182_v17, 0.0 }
 0x364   : > { %v1189_v20 = vmax.f32 %v1181_v18, 0.0 }
 0x366   : > { %v1571_v21 = vpack.c.bf16 %v1190_v19, %v1189_v20 }
 0x368   : > { %1573 = vmatprep.subr.msk.bf16.mxu0 %vm1970_vm13, %v1571_v21 }
 0x369   : > { %1576 = vmatpush3.bf16.xpose.msk.msra.mxu0 %vm1970_vm13, %v1571_v21 }
 0x370   : > { %1531 = vmatmul.mubr.msk.f32.vlgmr.msra.gmra.mrb[0].mxu0 %vm564_vm1, %v1192_v22 }
 0x443   : > { %v1532_v25 = vpop.f32.mrb[0].mxu0 }
 0x444   : > { %v1311_v26 = vmul.f32 %v1532_v25, %v1308_v24  ;;  %v1289_v27 = vpop.f32.mrb[1].mxu0 }
 0x445   : > { %v1310_v30 = vmul.f32 %v1303_v23, %v1289_v27 }
 0x446   : > { %v1325_v32 = vadd.f32 %v1322_v28, %v1311_v26 }
 0x447   : > { %v1324_v33 = vadd.f32 %v1317_v31, %v1310_v30 }
 0x448   : > { %v1327_v34 = vadd.f32 %v1325_v32, %v1695_v4 }
 0x449   : > { %v1326_v35 = vadd.f32 %v1324_v33, %v1692_v2 }
 0x44a   : > { %v1329_v36 = vmax.f32 %v1327_v34, 0.0 }
 0x44b   : > { %v1328_v37 = vmax.f32 %v1326_v35, 0.0 }
 0x44c   : > { %1332 = vst.msk [vmem:[%s359_s24 + $0x8] sm:$0xff] %vm1330_vm14, %v1329_v36 }
 0x44d   : > { %1331 = vst.msk [vmem:[%s359_s24] sm:$0xff] %vm1330_vm14, %v1328_v37 }
 0x44e PF: > { %s20_s13 = sadd.s32 1, %s1603_s13  }
 0x44f   : > { %p17_p4 = scmp.ge.s32.totalorder %s20_s13, 4  }
 0x451   :  { %19 = sbr.rel (!%p17_p4) target bundleno = 1 (0x1), region = 93 }

</bundles_post_ra>
